<compile_context>
chip_gen: v7x
topology: tpu7x:2x2x1
jax: 0.10.0
libtpu: 0.0.40
codegen_flags: <defaults>
</compile_context>

<pallas_src>
import jax
import jax.numpy as jnp
from jax.experimental import pallas as pl
from jax.experimental.pallas import tpu as pltpu

BN_EPS = 1e-5


def wide_deep_kernel(idx_ref, offs_ref, m1t_ref, b1_ref, w2t_ref, b2_ref,
                     w3t_ref, bias_ref, out_ref):
    num_fields, tile_b = idx_ref.shape
    d1p1, num_feats = m1t_ref.shape
    d1 = d1p1 - 1

    # Multi-hot gather mask: multihot[r, b] = 1 iff feature row r is selected
    # by any field of example b.  Offsets are added in-kernel (SMEM scalars);
    # fields occupy disjoint row ranges so bitwise OR is exact.  Accumulate as
    # bool and convert to f32 once (VPU is the binding unit here).
    idx = idx_ref[...]                                               # (F, TILE_B) int32
    row_ids = jax.lax.broadcasted_iota(jnp.int32, (num_feats, 1), 0)  # column iota
    hot = None
    for f in range(num_fields):                                      # static unroll (F tiny)
        g = row_ids == (idx[f:f + 1, :] + offs_ref[f])               # (num_feats, TILE_B) bool
        hot = g if hot is None else (hot | g)
    multihot = hot.astype(jnp.float32)

    # Fused: [deep layer-1 (BN folded, embedding gather as matmul); wide part]
    # in a single MXU pass.  Row d1 of m1t_aug is the FeaturesLinear weight.
    ha = jnp.dot(m1t_ref[...], multihot,
                 preferred_element_type=jnp.float32)                 # (d1+1, TILE_B)
    wide = ha[d1:d1 + 1, :]                                          # (1, TILE_B)
    h = jnp.maximum(ha[:d1, :] + b1_ref[...], 0.0)                   # ReLU (Dropout = identity)

    # Deep layer 2 (BN folded).
    h = jnp.maximum(
        jnp.dot(w2t_ref[...], h, preferred_element_type=jnp.float32) + b2_ref[...],
        0.0)                                                         # (d2, TILE_B)

    # MLP output layer -> lane-dense (1, TILE_B) logits.
    y = jnp.dot(w3t_ref[...], h, preferred_element_type=jnp.float32)

    out_ref[...] = jax.nn.sigmoid(y + wide + bias_ref[0, 0])


def init_params(key, field_dims, embed_dim, fc_dims):
    num_feats = int(sum(field_dims))
    in_dim = len(field_dims) * embed_dim
    ks = jax.random.split(key, 16)

    params = {
        "offsets": jnp.asarray(
            [0] + list(jnp.cumsum(jnp.asarray(field_dims))[:-1]), jnp.int32
        ),
        # FeaturesLinear: Embedding(num_feats, 1) + scalar bias
        "linear_weight": jax.random.normal(ks[0], (num_feats, 1), jnp.float32) * 0.1,
        "linear_bias": jax.random.normal(ks[1], (1, 1), jnp.float32) * 0.1,
        # FeaturesEmbedding: Embedding(num_feats, embed_dim)
        "embed_weight": jax.random.normal(ks[2], (num_feats, embed_dim), jnp.float32) * 0.1,
    }

    dims = [in_dim] + list(fc_dims)
    layer_keys = jax.random.split(ks[3], len(fc_dims) * 6)
    for li in range(len(fc_dims)):
        d_in, d_out = dims[li], dims[li + 1]
        kk = layer_keys[li * 6:(li + 1) * 6]
        params[f"w{li+1}"] = jax.random.normal(kk[0], (d_in, d_out), jnp.float32) * (1.0 / d_in) ** 0.5
        params[f"b{li+1}"] = jax.random.normal(kk[1], (1, d_out), jnp.float32) * 0.05
        params[f"gamma{li+1}"] = 1.0 + 0.05 * jax.random.normal(kk[2], (1, d_out), jnp.float32)
        params[f"beta{li+1}"] = 0.05 * jax.random.normal(kk[3], (1, d_out), jnp.float32)
        params[f"mean{li+1}"] = 0.05 * jax.random.normal(kk[4], (1, d_out), jnp.float32)
        params[f"var{li+1}"] = 1.0 + 0.1 * jax.random.uniform(kk[5], (1, d_out), jnp.float32)

    params["w_out"] = jax.random.normal(ks[4], (fc_dims[-1], 1), jnp.float32) * (1.0 / fc_dims[-1]) ** 0.5
    params["b_out"] = jax.random.normal(ks[5], (1, 1), jnp.float32) * 0.05
    return params


def fold_params(params, field_dims, embed_dim):
    """One-time weight transform: fold BN into Linear, fuse the embedding table
    with layer 1, append the wide weights as an extra row (so the kernel needs
    one fused matmul), and transpose everything to batch-in-lanes layout."""
    F = len(field_dims)
    E = embed_dim
    d1 = params["w1"].shape[1]

    s1 = params["gamma1"] * jax.lax.rsqrt(params["var1"] + BN_EPS)      # (1, d1)
    w1f = params["w1"] * s1                                             # (F*E, d1)
    b1f = (params["b1"] - params["mean1"]) * s1 + params["beta1"]       # (1, d1)

    s2 = params["gamma2"] * jax.lax.rsqrt(params["var2"] + BN_EPS)
    w2f = params["w2"] * s2                                             # (d1, d2)
    b2f = (params["b2"] - params["mean2"]) * s2 + params["beta2"]       # (1, d2)

    # Fuse embedding gather + layer-1 Linear:
    #   emb_flat @ W1' == sum_f table[idx_f] @ W1'[f*E:(f+1)*E]
    # so precompute M[r, :] = table[r, :] @ W1'[field(r)*E:(field(r)+1)*E, :].
    w1_blocks = w1f.reshape(F, E, d1)
    offs, acc = [], 0
    for fd in field_dims:
        offs.append(acc)
        acc += fd
    m_rows = []
    for f in range(F):
        tbl = params["embed_weight"][offs[f]:offs[f] + field_dims[f]]   # (fd, E)
        m_rows.append(jnp.dot(tbl, w1_blocks[f],
                              precision=jax.lax.Precision.HIGHEST))     # (fd, d1)
    M = jnp.concatenate(m_rows, axis=0)                                 # (num_feats, d1)

    # Fuse the wide (FeaturesLinear) weights as one extra row of the same
    # resident matrix: one MXU matmul gives both deep-layer-1 and wide.
    m1t_aug = jnp.concatenate([M.T, params["linear_weight"].T], axis=0)  # (d1+1, num_feats)

    return {
        "offsets": params["offsets"],                                   # (F,) int32, SMEM
        "m1t_aug": m1t_aug,                                             # (d1+1, num_feats)
        "b1c": b1f.T,                                                   # (d1, 1)
        "w2t": w2f.T,                                                   # (d2, d1)
        "b2c": b2f.T,                                                   # (d2, 1)
        "w3t": params["w_out"].T,                                       # (1, d2)
        "bias": (params["linear_bias"] + params["b_out"]).reshape(1, 1),
    }


def _pick_tile_b(batch, max_tile_b=2048):
    """Big tiles amortize the ~0.35 us per-grid-step overhead; keep >=2 tiles
    (when the batch allows) so ("parallel",) can split across v7x's two TCs."""
    b128 = pl.cdiv(batch, 128) * 128
    tile_b = min(max_tile_b, b128)
    if b128 >= 2 * 128 and (b128 // tile_b) < 2:
        tile_b = max(128, ((b128 // 2) // 128) * 128)
    return tile_b


def wide_deep_forward(x, folded, *, tile_b=None):
    """x: (B, F) int32 per-field indices. Returns sigmoid output of shape (B,).

    tile_b must be a multiple of 128.  If None, it is auto-picked: as large as
    possible (cap 2048) while keeping at least two batch tiles so the grid can
    be sharded across v7x's two TensorCores.  Per-step VMEM is ~0.5 KiB per
    batch column plus the tiny resident weight stack, so even tile_b=8192 is
    well under the 32 MiB default scoped VMEM limit."""
    B, F = x.shape
    if tile_b is None:
        tile_b = _pick_tile_b(B)
    assert tile_b % 128 == 0

    num_feats = folded["m1t_aug"].shape[1]
    d1p1 = folded["m1t_aug"].shape[0]
    d1, d2 = d1p1 - 1, folded["w2t"].shape[0]

    # Raw per-field indices, batch-in-lanes; offsets are added inside the
    # kernel (SMEM), so no extra XLA pass over the index tensor for the add.
    idx_t = x.astype(jnp.int32).T                                       # (F, B)
    n_tiles = pl.cdiv(B, tile_b)
    b_pad = n_tiles * tile_b
    if b_pad != B:
        # Pad ragged last tile with index 0 (valid rows; padded lanes compute
        # harmless values that are sliced off below -- never reduce over them).
        idx_t = jnp.pad(idx_t, ((0, 0), (0, b_pad - B)))

    weight_bytes = 4 * (d1p1 * num_feats + d1 + d2 * d1 + d2 + d2 + 1 + F)
    cost = pl.CostEstimate(
        flops=2 * b_pad * (num_feats * d1p1 + d1 * d2 + d2),
        transcendentals=b_pad,
        bytes_accessed=idx_t.size * 4 + b_pad * 4 + weight_bytes,
    )

    # Resident-weight design: all weight operands use index_map lambda i:(0,0)
    # so they are fetched once and stay in VMEM across the whole batch grid.
    # TODO(synk): if num_feats grows beyond a few hundred thousand rows the
    # resident fused table no longer fits (v7x VMEM is 64 MiB); switch to a
    # scalar-prefetch / make_async_copy DMA gather of the selected rows.
    out = pl.pallas_call(
        wide_deep_kernel,
        out_shape=jax.ShapeDtypeStruct((1, b_pad), jnp.float32),
        grid=(n_tiles,),
        in_specs=[
            pl.BlockSpec((F, tile_b), lambda i: (0, i)),                # per-tile indices
            pl.BlockSpec(memory_space=pltpu.MemorySpace.SMEM),          # field offsets (F,)
            pl.BlockSpec((d1p1, num_feats), lambda i: (0, 0)),          # resident: fused [table@W1'; lin_w]
            pl.BlockSpec((d1, 1), lambda i: (0, 0)),                    # resident: b1'
            pl.BlockSpec((d2, d1), lambda i: (0, 0)),                   # resident: W2'^T
            pl.BlockSpec((d2, 1), lambda i: (0, 0)),                    # resident: b2'
            pl.BlockSpec((1, d2), lambda i: (0, 0)),                    # resident: W3^T
            pl.BlockSpec(memory_space=pltpu.MemorySpace.SMEM),          # folded scalar bias
        ],
        out_specs=pl.BlockSpec((1, tile_b), lambda i: (0, i)),          # lane-dense output
        compiler_params=pltpu.CompilerParams(dimension_semantics=("parallel",)),
        cost_estimate=cost,
    )(idx_t, folded["offsets"], folded["m1t_aug"], folded["b1c"],
      folded["w2t"], folded["b2c"], folded["w3t"], folded["bias"])

    return out[0, :B]   # .squeeze(1)


def reference_forward(x, params):
    """Pure-JAX reference mirroring the PyTorch module (unfused, running-stats BN)."""
    B = x.shape[0]
    idx = x + params["offsets"][None, :]
    lin_y = jnp.sum(params["linear_weight"][idx, 0], axis=-1, keepdims=True) + params["linear_bias"]
    h = params["embed_weight"][idx].reshape(B, -1)
    for li in (1, 2):
        h = jnp.dot(h, params[f"w{li}"], precision=jax.lax.Precision.HIGHEST) + params[f"b{li}"]
        h = (h - params[f"mean{li}"]) * jax.lax.rsqrt(params[f"var{li}"] + BN_EPS)
        h = h * params[f"gamma{li}"] + params[f"beta{li}"]
        h = jnp.maximum(h, 0.0)
    mlp_y = jnp.dot(h, params["w_out"], precision=jax.lax.Precision.HIGHEST) + params["b_out"]
    return jax.nn.sigmoid(lin_y + mlp_y)[:, 0]


if __name__ == "__main__":
    field_dims = (8, 12, 6, 10)      # 4 fields
    embed_dim = 16                   # output_dim
    fc_dims = (32, 16)               # MLP hidden dims

    key = jax.random.PRNGKey(0)
    k_params, k_x1, k_x2 = jax.random.split(key, 3)
    params = init_params(k_params, field_dims, embed_dim, fc_dims)
    folded = fold_params(params, field_dims, embed_dim)

    def make_x(k, batch):
        ks = jax.random.split(k, len(field_dims))
        cols = [jax.random.randint(ks[i], (batch,), 0, field_dims[i])
                for i in range(len(field_dims))]
        return jnp.stack(cols, axis=1).astype(jnp.int32)     # (B, num_fields)

    # Kernel uses DEFAULT matmul precision (MXU has large slack; HIGHEST's
    # multi-pass combine costs VPU work), so compare against the f32 reference
    # at a bf16-pass-appropriate tolerance.
    TOL = 3e-3

    # Small case (single tile).
    x_small = make_x(k_x1, 8)
    out = jax.block_until_ready(wide_deep_forward(x_small, folded))
    ref = reference_forward(x_small, params)
    assert out.shape == (8,)
    assert jnp.allclose(out, ref, atol=TOL, rtol=TOL)

    # Larger / ragged case: exercises multi-tile grid (>=2 tiles for v7x
    # megacore sharding) and the padded last tile.
    x_big = make_x(k_x2, 300)
    out_big = jax.block_until_ready(wide_deep_forward(x_big, folded))
    ref_big = reference_forward(x_big, params)
    assert out_big.shape == (300,)
    assert jnp.allclose(out_big, ref_big, atol=TOL, rtol=TOL)

    print("KERNEL_OK")
</pallas_src>

<mosaic_0001>
module attributes {stable_mosaic.version = 11 : i64} {
  func.func @wide_deep_kernel(%arg0: i32, %arg1: memref<4x128xi32, #tpu.memory_space<vmem>>, %arg2: memref<4xi32, #tpu.memory_space<smem>>, %arg3: memref<33x36xf32, #tpu.memory_space<vmem>>, %arg4: memref<32x1xf32, #tpu.memory_space<vmem>>, %arg5: memref<16x32xf32, #tpu.memory_space<vmem>>, %arg6: memref<16x1xf32, #tpu.memory_space<vmem>>, %arg7: memref<1x16xf32, #tpu.memory_space<vmem>>, %arg8: memref<1x1xf32, #tpu.memory_space<smem>>, %arg9: memref<1x128xf32, #tpu.memory_space<vmem>>) attributes {dimension_semantics = [#tpu.dimension_semantics<parallel>], iteration_bounds = array<i64: 1>, scalar_prefetch = 0 : i64, scratch_operands = 0 : i64, tpu.core_type = #tpu.core_type<tc>, window_params = [{transform_indices = @transform_0, window_bounds = array<i64: 4, 128>}, {transform_indices = @transform_1, window_bounds = array<i64: 4>}, {pipeline_mode = #tpu.pipeline_mode<synchronous>, transform_indices = @transform_2, window_bounds = array<i64: 33, 36>}, {pipeline_mode = #tpu.pipeline_mode<synchronous>, transform_indices = @transform_3, window_bounds = array<i64: 32, 1>}, {pipeline_mode = #tpu.pipeline_mode<synchronous>, transform_indices = @transform_4, window_bounds = array<i64: 16, 32>}, {pipeline_mode = #tpu.pipeline_mode<synchronous>, transform_indices = @transform_5, window_bounds = array<i64: 16, 1>}, {pipeline_mode = #tpu.pipeline_mode<synchronous>, transform_indices = @transform_6, window_bounds = array<i64: 1, 16>}, {transform_indices = @transform_7, window_bounds = array<i64: 1, 1>}, {transform_indices = @transform_8, window_bounds = array<i64: 1, 128>}]} {
    %c0 = arith.constant 0 : index
    %c0_0 = arith.constant 0 : index
    %0 = vector.load %arg1[%c0, %c0_0] : memref<4x128xi32, #tpu.memory_space<vmem>>, vector<4x128xi32>
    %1 = tpu.iota {dimensions = array<i32: 0>} : vector<36x1xi32>
    %2 = vector.extract_strided_slice %0 {offsets = [0, 0], sizes = [1, 128], strides = [1, 1]} : vector<4x128xi32> to vector<1x128xi32>
    %c0_1 = arith.constant 0 : index
    %3 = memref.load %arg2[%c0_1] : memref<4xi32, #tpu.memory_space<smem>>
    %4 = vector.broadcast %3 : i32 to vector<1x128xi32>
    %5 = arith.addi %2, %4 : vector<1x128xi32>
    %6 = vector.broadcast %1 : vector<36x1xi32> to vector<36x128xi32>
    %7 = vector.broadcast %5 : vector<1x128xi32> to vector<36x128xi32>
    %8 = arith.cmpi eq, %6, %7 : vector<36x128xi32>
    %9 = vector.extract_strided_slice %0 {offsets = [1, 0], sizes = [1, 128], strides = [1, 1]} : vector<4x128xi32> to vector<1x128xi32>
    %c1 = arith.constant 1 : index
    %10 = memref.load %arg2[%c1] : memref<4xi32, #tpu.memory_space<smem>>
    %11 = vector.broadcast %10 : i32 to vector<1x128xi32>
    %12 = arith.addi %9, %11 : vector<1x128xi32>
    %13 = vector.broadcast %1 : vector<36x1xi32> to vector<36x128xi32>
    %14 = vector.broadcast %12 : vector<1x128xi32> to vector<36x128xi32>
    %15 = arith.cmpi eq, %13, %14 : vector<36x128xi32>
    %16 = arith.ori %8, %15 : vector<36x128xi1>
    %17 = vector.extract_strided_slice %0 {offsets = [2, 0], sizes = [1, 128], strides = [1, 1]} : vector<4x128xi32> to vector<1x128xi32>
    %c2 = arith.constant 2 : index
    %18 = memref.load %arg2[%c2] : memref<4xi32, #tpu.memory_space<smem>>
    %19 = vector.broadcast %18 : i32 to vector<1x128xi32>
    %20 = arith.addi %17, %19 : vector<1x128xi32>
    %21 = vector.broadcast %1 : vector<36x1xi32> to vector<36x128xi32>
    %22 = vector.broadcast %20 : vector<1x128xi32> to vector<36x128xi32>
    %23 = arith.cmpi eq, %21, %22 : vector<36x128xi32>
    %24 = arith.ori %16, %23 : vector<36x128xi1>
    %25 = vector.extract_strided_slice %0 {offsets = [3, 0], sizes = [1, 128], strides = [1, 1]} : vector<4x128xi32> to vector<1x128xi32>
    %c3 = arith.constant 3 : index
    %26 = memref.load %arg2[%c3] : memref<4xi32, #tpu.memory_space<smem>>
    %27 = vector.broadcast %26 : i32 to vector<1x128xi32>
    %28 = arith.addi %25, %27 : vector<1x128xi32>
    %29 = vector.broadcast %1 : vector<36x1xi32> to vector<36x128xi32>
    %30 = vector.broadcast %28 : vector<1x128xi32> to vector<36x128xi32>
    %31 = arith.cmpi eq, %29, %30 : vector<36x128xi32>
    %32 = arith.ori %24, %31 : vector<36x128xi1>
    %33 = arith.extui %32 : vector<36x128xi1> to vector<36x128xi32>
    %34 = arith.sitofp %33 : vector<36x128xi32> to vector<36x128xf32>
    %c0_2 = arith.constant 0 : index
    %c0_3 = arith.constant 0 : index
    %35 = vector.load %arg3[%c0_2, %c0_3] : memref<33x36xf32, #tpu.memory_space<vmem>>, vector<33x36xf32>
    %cst = arith.constant dense<0.000000e+00> : vector<33x128xf32>
    %36 = tpu.matmul %35, %34, %cst {dimension_numbers = #tpu.dot_dimension_numbers<[1], [0], [0], [1], [0, 0, 1, 1], [], []>} : vector<33x36xf32>, vector<36x128xf32>, vector<33x128xf32> -> vector<33x128xf32>
    %37 = vector.extract_strided_slice %36 {offsets = [32, 0], sizes = [1, 128], strides = [1, 1]} : vector<33x128xf32> to vector<1x128xf32>
    %38 = vector.extract_strided_slice %36 {offsets = [0, 0], sizes = [32, 128], strides = [1, 1]} : vector<33x128xf32> to vector<32x128xf32>
    %c0_4 = arith.constant 0 : index
    %c0_5 = arith.constant 0 : index
    %39 = vector.load %arg4[%c0_4, %c0_5] : memref<32x1xf32, #tpu.memory_space<vmem>>, vector<32x1xf32>
    %40 = vector.broadcast %39 : vector<32x1xf32> to vector<32x128xf32>
    %41 = arith.addf %38, %40 : vector<32x128xf32>
    %cst_6 = arith.constant 0.000000e+00 : f32
    %42 = vector.broadcast %cst_6 : f32 to vector<32x128xf32>
    %43 = arith.maximumf %41, %42 : vector<32x128xf32>
    %c0_7 = arith.constant 0 : index
    %c0_8 = arith.constant 0 : index
    %44 = vector.load %arg5[%c0_7, %c0_8] : memref<16x32xf32, #tpu.memory_space<vmem>>, vector<16x32xf32>
    %cst_9 = arith.constant dense<0.000000e+00> : vector<16x128xf32>
    %45 = tpu.matmul %44, %43, %cst_9 {dimension_numbers = #tpu.dot_dimension_numbers<[1], [0], [0], [1], [0, 0, 1, 1], [], []>} : vector<16x32xf32>, vector<32x128xf32>, vector<16x128xf32> -> vector<16x128xf32>
    %c0_10 = arith.constant 0 : index
    %c0_11 = arith.constant 0 : index
    %46 = vector.load %arg6[%c0_10, %c0_11] : memref<16x1xf32, #tpu.memory_space<vmem>>, vector<16x1xf32>
    %47 = vector.broadcast %46 : vector<16x1xf32> to vector<16x128xf32>
    %48 = arith.addf %45, %47 : vector<16x128xf32>
    %cst_12 = arith.constant 0.000000e+00 : f32
    %49 = vector.broadcast %cst_12 : f32 to vector<16x128xf32>
    %50 = arith.maximumf %48, %49 : vector<16x128xf32>
    %c0_13 = arith.constant 0 : index
    %c0_14 = arith.constant 0 : index
    %51 = vector.load %arg7[%c0_13, %c0_14] : memref<1x16xf32, #tpu.memory_space<vmem>>, vector<1x16xf32>
    %cst_15 = arith.constant dense<0.000000e+00> : vector<1x128xf32>
    %52 = tpu.matmul %51, %50, %cst_15 {dimension_numbers = #tpu.dot_dimension_numbers<[1], [0], [0], [1], [0, 0, 1, 1], [], []>} : vector<1x16xf32>, vector<16x128xf32>, vector<1x128xf32> -> vector<1x128xf32>
    %53 = arith.addf %52, %37 : vector<1x128xf32>
    %c0_16 = arith.constant 0 : index
    %c0_17 = arith.constant 0 : index
    %54 = memref.load %arg8[%c0_16, %c0_17] : memref<1x1xf32, #tpu.memory_space<smem>>
    %55 = vector.broadcast %54 : f32 to vector<1x128xf32>
    %56 = arith.addf %53, %55 : vector<1x128xf32>
    %57 = arith.negf %56 : vector<1x128xf32>
    %58 = math.exp %57 : vector<1x128xf32>
    %cst_18 = arith.constant 1.000000e+00 : f32
    %59 = vector.broadcast %cst_18 : f32 to vector<1x128xf32>
    %60 = arith.addf %59, %58 : vector<1x128xf32>
    %61 = arith.divf %59, %60 : vector<1x128xf32>
    %c0_19 = arith.constant 0 : index
    %c0_20 = arith.constant 0 : index
    %62 = vector.load %arg9[%c0_19, %c0_20] : memref<1x128xf32, #tpu.memory_space<vmem>>, vector<1x128xf32>
    tpu.vector_store %arg9[%c0_19, %c0_20], %61 {strides = array<i32>} : memref<1x128xf32, #tpu.memory_space<vmem>>, vector<1x128xf32>,
    return
  }
  func.func @transform_0(%arg0: i32) -> (i32, i32) {
    %c0_i32 = arith.constant 0 : i32
    %c0_i32_0 = arith.constant 0 : i32
    return %c0_i32, %arg0 : i32, i32
  }
  func.func @transform_1(%arg0: i32) -> i32 {
    %c0_i32 = arith.constant 0 : i32
    %c0_i32_0 = arith.constant 0 : i32
    return %c0_i32 : i32
  }
  func.func @transform_2(%arg0: i32) -> (i32, i32) {
    %c0_i32 = arith.constant 0 : i32
    %c0_i32_0 = arith.constant 0 : i32
    %c0_i32_1 = arith.constant 0 : i32
    return %c0_i32, %c0_i32_0 : i32, i32
  }
  func.func @transform_3(%arg0: i32) -> (i32, i32) {
    %c0_i32 = arith.constant 0 : i32
    %c0_i32_0 = arith.constant 0 : i32
    %c0_i32_1 = arith.constant 0 : i32
    return %c0_i32, %c0_i32_0 : i32, i32
  }
  func.func @transform_4(%arg0: i32) -> (i32, i32) {
    %c0_i32 = arith.constant 0 : i32
    %c0_i32_0 = arith.constant 0 : i32
    %c0_i32_1 = arith.constant 0 : i32
    return %c0_i32, %c0_i32_0 : i32, i32
  }
  func.func @transform_5(%arg0: i32) -> (i32, i32) {
    %c0_i32 = arith.constant 0 : i32
    %c0_i32_0 = arith.constant 0 : i32
    %c0_i32_1 = arith.constant 0 : i32
    return %c0_i32, %c0_i32_0 : i32, i32
  }
  func.func @transform_6(%arg0: i32) -> (i32, i32) {
    %c0_i32 = arith.constant 0 : i32
    %c0_i32_0 = arith.constant 0 : i32
    %c0_i32_1 = arith.constant 0 : i32
    return %c0_i32, %c0_i32_0 : i32, i32
  }
  func.func @transform_7(%arg0: i32) -> (i32, i32) {
    %c0_i32 = arith.constant 0 : i32
    %c0_i32_0 = arith.constant 0 : i32
    %c0_i32_1 = arith.constant 0 : i32
    return %c0_i32, %c0_i32_0 : i32, i32
  }
  func.func @transform_8(%arg0: i32) -> (i32, i32) {
    %c0_i32 = arith.constant 0 : i32
    %c0_i32_0 = arith.constant 0 : i32
    return %c0_i32, %arg0 : i32, i32
  }
}

</mosaic_0001>

<bundles_post_ra>
// kernel: tpu_custom_call.1
= control target key start
LH: loop header
LB: loop body
LE: loop exit
PB: predicated region body
PF: predicated region fallthrough
CT: control target
= control target key end

     0   :  { %14 = vsyncpa [#allocation5], 0  ;;  %s774_s0 = inlined_call_operand.vmem [shape: s32[4,128], index: 0, kind: input, shape index: {}]   ;;  %s775_s1 = inlined_call_operand.vmem [shape: s32[4], index: 1, kind: input, shape index: {}]   ;;  %s776_s2 = inlined_call_operand.vmem [shape: f32[33,36], index: 2, kind: input, shape index: {}]   ;;  %s777_s3 = inlined_call_operand.vmem [shape: f32[32,1], index: 3, kind: input, shape index: {}]   ;;  %s778_s4 = inlined_call_operand.vmem [shape: f32[16,32], index: 4, kind: input, shape index: {}]   ;;  %s779_s5 = inlined_call_operand.vmem [shape: f32[16,1], index: 5, kind: input, shape index: {}]   ;;  %s780_s6 = inlined_call_operand.vmem [shape: f32[1,16], index: 6, kind: input, shape index: {}]   ;;  %s781_s7 = inlined_call_operand.<no memory space> [shape: f32[1,1], index: 7, kind: input, shape index: {}]   ;;  %s782_s8 = inlined_call_operand.hbm [shape: f32[1,128], index: 8, kind: output, shape index: {}]  }
   0x1   :  { %15 = vsyncpa [#allocation4], 0  ;;  %s24_s29 = sshll.u32 %s775_s1, 4  ;;  %s25_s29 = int_to_ptr.vmem [resolvable:$true] %s24_s29 }
   0x2   :  { %s583_s30 = scalar_lea.vmem %s25_s29, 16  ;;  %p588_p1 = scmp.lt.s32.totalorder %s25_s29, %s25_s29 }
   0x3   :  { %p584_p0 = scmp.ne.s32.totalorder %s25_s29, %s583_s30  ;;  %p589_p2 = scmp.lt.s32.totalorder %s583_s30, %s583_s30 }
   0x5   :  { %p590_p3 = por %p589_p2, %p588_p1 }
   0x7   :  { %p591_p4 = pnand %p590_p3, %p584_p0 }
   0x9   :  { %594 = shalt.err (!%p591_p4)
}
   0xa   :  { %s621_s9 = smov [#allocation3]  }
   0xb   :  { %27 = dma.vmem_to_smem %s25_s29, 16, %s621_s9, [#allocation5]  }
   0xc   :  { %617 = dma.done.wait [#allocation5], 16  }
   0xd   :  { %618 = vsyncadd [#allocation5], 4294967280 }
   0xe   :  { %43 = sfence }
   0xf   :  { %v45_v0 = vlaneseq  ;;  %s51_s10 = sld [smem:[#allocation3]]  ;;  %v622_v1 = vmov 0.0|0.0   ;;  %s469_s11 = sld [smem:[#allocation3 + $0x1]]  ;;  %vm783_vm0 = vmmov 0   ;;  %v624_v3 = vmov 0.0   ;;  %v239_v6 = vld [vmem:[%s777_s3] sm:$0xff] }
  0x10   :  { %553 = vmatprep.subr.bf16.mxu0 %v622_v1  ;;  %s470_s1 = sld [smem:[#allocation3 + $0x2]]  ;;  %s471_s12 = sld [smem:[#allocation3 + $0x3]]  ;;  %520 = vmatprep.mubr.msk.f32.mxu0 %vm783_vm0, %v624_v3  ;;  %v44_v4 = vld [vmem:[%s774_s0] sm:$0xf]  ;;  %v625_v5 = vmov 0   ;;  %v241_v7 = vld [vmem:[%s777_s3 + $0x10] sm:$0xff] }
  0x11   :  { %v677_v2 = vshrl.u32 %v45_v0, 7  ;;  %577 = vset.pattern.permute.xlu0 %v625_v5  ;;  %578 = vset.pattern.permute.xlu1 %v625_v5  ;;  %v240_v13 = vld [vmem:[%s777_s3 + $0x8] sm:$0xff]  ;;  %v242_v14 = vld [vmem:[%s777_s3 + $0x18] sm:$0xff]  ;;  %v273_v26 = vld [vmem:[%s779_s5] sm:$0xff]  ;;  %v626_v31 = vmov 1.0|1.0  }
  0x12   :  { %245 = vperm.xlu0 %577, %v239_v6   ;;  %255 = vperm.xlu1 %578, %v241_v7   ;;  %v274_v28 = vld [vmem:[%s779_s5 + $0x8] sm:$0xff]  ;;  %v124_v33 = vld [vmem:[%s776_s2] sm:$0xff]  ;;  %v126_v36 = vld [vmem:[%s776_s2 + $0x10] sm:$0xff]  ;;  %s627_s17 = smov [#allocation6]  }
  0x13   :  { %v56_v8 = vsub.s32 0, %v677_v2  ;;  %v47_v9 = vadd.s32 8, %v677_v2  ;;  %v68_v11 = vsub.s32 1, %v677_v2  ;;  %v85_v12 = vsub.s32 2, %v677_v2  ;;  %v125_v35 = vld [vmem:[%s776_s2 + $0x8] sm:$0xff]  ;;  %v127_v37 = vld [vmem:[%s776_s2 + $0x18] sm:$0xff] }
  0x14   :  { %v102_v18 = vsub.s32 3, %v677_v2  ;;  %v48_v29 = vadd.s32 16, %v677_v2  ;;  %v49_v30 = vadd.s32 24, %v677_v2  ;;  %v50_v32 = vadd.s32 32, %v677_v2  ;;  %v271_v38 = vld [vmem:[%s778_s4] sm:$0xff]  ;;  %v272_v61 = vld [vmem:[%s778_s4 + $0x8] sm:$0xff] }
  0x15   :  { %v52_v10 = vstv %s51_s10  ;;  %v64_v16 = vstv %s469_s11  ;;  %v128_v62 = vld [vmem:[%s776_s2 + $0x20] sm:$0x1]  ;;  %s460_s18 = sshll.u32 %s627_s17, 4  ;;  %s461_s18 = int_to_ptr.vmem [resolvable:$true] %s460_s18 }
  0x16   :  { %v53_v15 = vadd.s32 %v52_v10, %v44_v4  ;;  %v81_v17 = vstv %s470_s1  ;;  %v65_v19 = vadd.s32 %v64_v16, %v44_v4  ;;  %v98_v21 = vstv %s471_s12  ;;  %250 = vperm.xlu0 %577, %v240_v13   ;;  %260 = vperm.xlu1 %578, %v242_v14   ;;  %s599_s0 = scalar_lea.vmem %s461_s18, 32  ;;  %p600_p6 = scmp.lt.s32.totalorder %s461_s18, %s461_s18 }
  0x17   :  { %v82_v20 = vadd.s32 %v81_v17, %v44_v4  ;;  %v99_v23 = vadd.s32 %v98_v21, %v44_v4 }
  0x18   :  { %v57_v22 = vrot.slane %v53_v15, %v56_v8  ;;  %v69_v24 = vrot.slane %v65_v19, %v68_v11 }
  0x19   :  { %v86_v25 = vrot.slane %v82_v20, %v85_v12  ;;  %v103_v27 = vrot.slane %v99_v23, %v102_v18  ;;  %v445_v12 = vstv %s781_s7 }
  0x1a   :  { %vm58_vm1 = vcmp.eq.s32.totalorder %v677_v2, %v57_v22  ;;  %vm59_vm2 = vcmp.eq.s32.totalorder %v47_v9, %v57_v22  ;;  %vm70_vm3 = vcmp.eq.s32.totalorder %v677_v2, %v69_v24  ;;  %vm71_vm4 = vcmp.eq.s32.totalorder %v47_v9, %v69_v24  ;;  %277 = vperm.xlu0 %577, %v273_v26  }
  0x1b   :  { %vm87_vm5 = vcmp.eq.s32.totalorder %v677_v2, %v86_v25  ;;  %vm75_vm6 = vmor %vm58_vm1, %vm70_vm3  ;;  %vm88_vm7 = vcmp.eq.s32.totalorder %v47_v9, %v86_v25  ;;  %vm104_vm9 = vcmp.eq.s32.totalorder %v677_v2, %v103_v27  ;;  %282 = vperm.xlu1 %578, %v274_v28   ;;  %vm105_vm11 = vcmp.eq.s32.totalorder %v47_v9, %v103_v27 }
  0x1c   :  { %vm76_vm8 = vmor %vm59_vm2, %vm71_vm4  ;;  %vm60_vm14 = vcmp.eq.s32.totalorder %v48_v29, %v57_v22  ;;  %vm72_vm15 = vcmp.eq.s32.totalorder %v48_v29, %v69_v24  ;;  %vm61_vm1 = vcmp.eq.s32.totalorder %v49_v30, %v57_v22  ;;  %vm73_vm3 = vcmp.eq.s32.totalorder %v49_v30, %v69_v24 }
  0x1d   :  { %vm92_vm10 = vmor %vm75_vm6, %vm87_vm5  ;;  %vm89_vm4 = vcmp.eq.s32.totalorder %v48_v29, %v86_v25  ;;  %vm90_vm6 = vcmp.eq.s32.totalorder %v49_v30, %v86_v25 }
  0x1e   :  { %vm93_vm12 = vmor %vm76_vm8, %vm88_vm7  ;;  %vm106_vm8 = vcmp.eq.s32.totalorder %v48_v29, %v103_v27 }
  0x1f   :  { %vm109_vm13 = vmor %vm92_vm10, %vm104_vm9  ;;  %vm107_vm10 = vcmp.eq.s32.totalorder %v49_v30, %v103_v27 }
  0x20   :  { %vm110_vm0 = vmor %vm93_vm12, %vm105_vm11 }
  0x21   :  { %vm554_vm2 = vmpackc.low %vm110_vm0, %vm109_vm13  ;;  %vm62_vm0 = vcmp.eq.s32.totalorder %v50_v32, %v57_v22  ;;  %vm74_vm13 = vcmp.eq.s32.totalorder %v50_v32, %v69_v24 }
  0x22   :  { %555 = vmatpush3.bf16.msk.msra.mxu0 %vm554_vm2, %v626_v31  ;;  %vm77_vm5 = vmor %vm60_vm14, %vm72_vm15  ;;  %vm91_vm14 = vcmp.eq.s32.totalorder %v50_v32, %v86_v25 }
  0x23   :  { %556 = vmatprep.subr.bf16.mxu0 %v622_v1  ;;  %vm78_vm7 = vmor %vm61_vm1, %vm73_vm3  ;;  %vm108_vm1 = vcmp.eq.s32.totalorder %v50_v32, %v103_v27 }
  0x24   :  { %vm94_vm9 = vmor %vm77_vm5, %vm89_vm4  ;;  %vm145_vm5 = vcmask 1043456  }
  0x25   :  { %vm95_vm11 = vmor %vm78_vm7, %vm90_vm6  ;;  %vm129_vm7 = vcmask 293888  }
  0x26   :  { %vm111_vm12 = vmor %vm94_vm9, %vm106_vm8  ;;  %vm785_vm8 = vmmov 0   ;;  %vm285_vm9 = vcmask 261120  }
  0x27   :  { %vm112_vm2 = vmor %vm95_vm11, %vm107_vm10  ;;  %543 = vmatprep.mubr.msk.f32.mxu1 %vm285_vm9, %v271_v38  ;;  %vm370_vm10 = vcmask 130048  }
  0x28   :  { %vm557_vm15 = vmpackc.low %vm112_vm2, %vm111_vm12 }
  0x29   :  { %558 = vmatpush3.bf16.msk.msra.mxu0 %vm557_vm15, %v626_v31  ;;  %vm79_vm3 = vmor %vm62_vm0, %vm74_vm13 }
  0x2a   :  { %518 = vmatprep.subr.mxu0 %v624_v3  ;;  %vm96_vm4 = vmor %vm79_vm3, %vm91_vm14 }
  0x2b   :  { %vm113_vm6 = vmor %vm96_vm4, %vm108_vm1 }
  0x2c   :  { %v476_v34 = vsel %vm113_vm6, 1.0, %v624_v3 }
  0x2d   :  { %519 = vmatpush3.msk.msra.mxu0 %vm145_vm5, %v476_v34 }
  0x2e   :  { %521 = vmatmul.mubr.msk.f32.vlgmr.msra.gmra.mrb[0].mxu0 %vm129_vm7, %v124_v33 }
  0x2f   :  { %523 = vmatprep.mubr.msk.f32.mxu0 %vm785_vm8, %v624_v3 }
  0x32   :  { %524 = vmatmul.mubr.msk.f32.gmra.mrb[2].mxu0 %vm129_vm7, %v125_v35 }
  0x33   :  { %526 = vmatprep.mubr.msk.f32.mxu0 %vm785_vm8, %v624_v3 }
  0x36   :  { %527 = vmatmul.mubr.msk.f32.gmra.mrb[4].mxu0 %vm129_vm7, %v126_v36 }
  0x37   :  { %529 = vmatprep.mubr.msk.f32.mxu0 %vm785_vm8, %v624_v3 }
  0x3a   :  { %530 = vmatmul.mubr.msk.f32.gmra.mrb[6].mxu0 %vm129_vm7, %v127_v37 }
  0x3b   :  { %532 = vmatprep.mubr.msk.f32.mxu0 %vm785_vm8, %v624_v3 }
  0x3e   :  { %533 = vmatmul.mubr.msk.f32.gmra.mrb[8].mxu0 %vm129_vm7, %v128_v62 }
  0x91   :  { %v246_v39 = vpop.permute.xlu0 %245  ;;  %v256_v47 = vpop.permute.xlu1 %255 }
  0x95   :  { %v251_v43 = vpop.permute.xlu0 %250  ;;  %v261_v54 = vpop.permute.xlu1 %260 }
  0x99   :  { %v278_v2 = vpop.permute.xlu0 %277 }
  0x9a   :  { %v283_v63 = vpop.permute.xlu1 %282 }
 0x101   :  { %v215_v40 = vpop.f32.mrb[0].mxu0 }
 0x102   :  { %v522_v41 = vpop.f32.mrb[1].mxu0  ;;  %v263_v42 = vadd.f32 %v246_v39, %v215_v40 }
 0x104   :  { %v267_v48 = vmax.f32 %v263_v42, 0.0 }
 0x105   :  { %v220_v44 = vpop.f32.mrb[2].mxu0 }
 0x106   :  { %v264_v45 = vadd.f32 %v251_v43, %v220_v44  ;;  %v525_v46 = vpop.f32.mrb[3].mxu0 }
 0x108   :  { %v268_v49 = vmax.f32 %v264_v45, 0.0 }
 0x109   :  { %v225_v50 = vpop.f32.mrb[4].mxu0 }
 0x10a   :  { %v528_v51 = vpop.f32.mrb[5].mxu0  ;;  %v559_v52 = vpack.c.bf16 %v268_v49, %v267_v48  ;;  %v265_v53 = vadd.f32 %v256_v47, %v225_v50 }
 0x10c   :  { %560 = vmatprep.subr.bf16.mxu1 %v559_v52  ;;  %v269_v58 = vmax.f32 %v265_v53, 0.0 }
 0x10d   :  { %v230_v55 = vpop.f32.mrb[6].mxu0  ;;  %562 = vmatpush3.bf16.msra.mxu1 %v559_v52 }
 0x10e   :  { %v266_v56 = vadd.f32 %v261_v54, %v230_v55  ;;  %v531_v57 = vpop.f32.mrb[7].mxu0 }
 0x110   :  { %v270_v59 = vmax.f32 %v266_v56, 0.0 }
 0x111   :  { %v235_v9 = vpop.f32.mrb[8].mxu0 }
 0x112   :  { %v563_v60 = vpack.c.bf16 %v270_v59, %v269_v58  ;;  %v534_v10 = vpop.f32.mrb[9].mxu0 }
 0x114   :  { %564 = vmatprep.subr.bf16.mxu1 %v563_v60 }
 0x115   :  { %566 = vmatpush3.bf16.msra.mxu1 %v563_v60 }
 0x116   :  { %567 = vmatprep.subr.bf16.mxu1 %v622_v1 }
 0x118   :  { %544 = vmatmul.mubr.msk.f32.vlgmr.msra.gmra.mrb[0].mxu1 %vm285_vm9, %v272_v61 }
 0x119   :  { %550 = vmatprep.mubr.msk.f32.mxu1 %vm785_vm8, %v624_v3  ;;  %v369_v3 = vld [vmem:[%s780_s6] sm:$0x1]  ;;  %s595_s6 = scalar_lea.vmem %s461_s18, 16 }
 0x11a   :  { %p596_p5 = scmp.ne.s32.totalorder %s461_s18, %s595_s6  ;;  %p601_p7 = scmp.lt.s32.totalorder %s599_s0, %s595_s6 }
 0x11c   :  { %p602_p8 = por %p601_p7, %p600_p6 }
 0x11e   :  { %p603_p9 = pnand %p602_p8, %p596_p5 }
 0x1eb   :  { %v545_v0 = vpop.f32.mrb[0].mxu1 }
 0x1ec   :  { %v364_v4 = vadd.f32 %v545_v0, %v283_v63  ;;  %v358_v5 = vpop.f32.mrb[1].mxu1 }
 0x1ed   :  { %v359_v6 = vadd.f32 %v358_v5, %v278_v2 }
 0x1ee   :  { %v368_v7 = vmax.f32 %v364_v4, 0.0 }
 0x1ef   :  { %v367_v8 = vmax.f32 %v359_v6, 0.0 }
 0x1f1   :  { %v568_v1 = vpack.c.bf16 %v368_v7, %v367_v8 }
 0x1f3   :  { %569 = vmatpush3.bf16.msra.mxu1 %v568_v1 }
 0x1f6   :  { %551 = vmatmul.mubr.msk.f32.vlgmr.msra.gmra.mrb[2].mxu1 %vm370_vm10, %v369_v3 }
 0x2c9   :  { %v440_v11 = vpop.f32.mrb[2].mxu1 }
 0x2ca   :  { %v441_v13 = vadd.f32 %v440_v11, %v235_v9  ;;  %v552_v14 = vpop.f32.mrb[3].mxu1 }
 0x2cc   :  { %v446_v15 = vadd.f32 %v445_v12, %v441_v13 }
 0x2ce   :  { %v490_v16 = vmul.f32 -1.442695, %v446_v15 }
 0x2d0   :  { %579 = vpow2.f32 %v490_v16 }
 0x2da   :  { %v580_v17 = vpop.eup %579 }
 0x2db   :  { %v450_v18 = vadd.f32 1.0, %v580_v17 }
 0x2dd   :  { %581 = vrcp.f32 %v450_v18 }
 0x2e7   :  { %v582_v19 = vpop.eup %581 }
 0x2e8   :  { %453 = vst [vmem:[#allocation6] sm:$0x1] %v582_v19 }
 0x2e9   :  { %606 = shalt.err (!%p603_p9)
}
 0x2ea   :  { %s607_s20 = scalar_lea.hbm %s782_s8, 16 }
 0x2eb   :  { %p608_p10 = scmp.ne.s32.totalorder %s782_s8, %s607_s20  ;;  %p611_p11 = scmp.lt.u32.totalorder %s607_s20, %s782_s8 }
 0x2ed   :  { %p613_p12 = pnand %p611_p11, %p608_p10 }
 0x2ef   :  { %616 = shalt.err (!%p613_p12)
}
 0x2f0   :  { %463 = dma.vmem_to_hbm [thread:$0]  %s461_s18, 16, %s782_s8, [#allocation4]  }
 0x2f1   :  { %619 = dma.done.wait [#allocation4], 16  }
 0x2f2   :  { %620 = vsyncadd [#allocation4], 4294967280 }
 0x2f3   :  { %467 = vsyncpa [#allocation4], 1 }
 0x2f4   :  { %468 = vsyncpa [#allocation5], 1 }

</bundles_post_ra>
